<compile_context>
chip_gen: v6e
topology: v6e:2x2x1
jax: 0.10.0
libtpu: 0.0.40
codegen_flags: <defaults>
</compile_context>

<pallas_src>
import functools

import jax
import jax.numpy as jnp
import numpy as np
from jax import lax
from jax.experimental import pallas as pl
from jax.experimental.pallas import tpu as pltpu


def _conv2d_relu_kernel(x_ref, w_ref, b_ref, o_ref, *,
                        B_blk, OH, KH, stride, compute_dtype):
    """B_blk batch elements: KH banded matmuls + bias + ReLU.

    x_ref: (B_blk, Hp, Wp*Cin)      padded, channel-folded input
    w_ref: (KH, Wp*Cin, OW*Cout)    banded weight (built once in the wrapper)
    b_ref: (1, OW*Cout)             bias replicated per output column
    o_ref: (B_blk, OH, OW*Cout)     lane-dense output
    """
    WpC = x_ref.shape[-1]
    OWC = o_ref.shape[-1]
    flatten = (OH % 8 == 0)   # sublane-aligned -> leading-dim merge is cheap

    def taps(kh):
        if stride == 1:
            rows = x_ref[:, kh:kh + OH, :]          # static ref-view row slice
        else:
            # TODO(synk): strided pl.ds on the sublane dim is the documented
            # API but only the stride=1 path is exercised by the test below.
            rows = x_ref[:, pl.ds(kh, OH, stride), :]
        return rows.astype(compute_dtype)

    acc = None
    for kh in range(KH):                            # static unroll: KH matmuls
        w_kh = w_ref[kh]                            # (Wp*Cin, OW*Cout)
        r = taps(kh)                                # (B_blk, OH, Wp*Cin)
        if flatten:
            part = jnp.dot(r.reshape(B_blk * OH, WpC), w_kh,
                           preferred_element_type=jnp.float32)
        else:
            part = jnp.einsum("bhk,kn->bhn", r, w_kh,
                              preferred_element_type=jnp.float32)
        acc = part if acc is None else acc + part

    out = jnp.maximum(acc + b_ref[...].astype(jnp.float32), 0.0)
    o_ref[...] = out.reshape(B_blk, OH, OWC).astype(o_ref.dtype)


def _largest_divisor_leq(n, cap):
    cap = max(1, min(n, cap))
    for d in range(cap, 0, -1):
        if n % d == 0:
            return d
    return 1


def conv2d_block_forward(x_nchw, weight_oihw, bias, *, stride=1, padding=0,
                         batch_block=None, matmul_dtype=None):
    """F.relu(conv2d(x, w, b, stride, padding)) with PyTorch NCHW semantics."""
    N, Cin, H, W = x_nchw.shape
    Cout, Cin_w, KH, KW = weight_oihw.shape
    assert Cin == Cin_w
    OH = (H + 2 * padding - KH) // stride + 1
    OW = (W + 2 * padding - KW) // stride + 1
    Hp, Wp = H + 2 * padding, W + 2 * padding
    WpC, OWC = Wp * Cin, OW * Cout
    compute_dtype = (jnp.dtype(matmul_dtype) if matmul_dtype is not None
                     else jnp.dtype(x_nchw.dtype))

    # ---------- layout glue (plain JAX / XLA) ----------
    x_nhwc = jnp.transpose(x_nchw, (0, 2, 3, 1))
    x_pad = jnp.pad(x_nhwc, ((0, 0), (padding, padding),
                             (padding, padding), (0, 0)))
    x_folded = x_pad.reshape(N, Hp, WpC)            # Cin folded into the lane dim

    # Banded (Toeplitz) weight, built once:
    #   band[kh, (ow*stride+kw)*Cin + ci, ow*Cout + co] = w[co, ci, kh, kw]
    w_hwio = jnp.transpose(weight_oihw, (2, 3, 1, 0))          # (KH, KW, Cin, Cout)
    ow_i, kw_i, ci_i, co_i = np.meshgrid(np.arange(OW), np.arange(KW),
                                         np.arange(Cin), np.arange(Cout),
                                         indexing="ij")
    row_idx = ((ow_i * stride + kw_i) * Cin + ci_i).ravel()
    col_idx = (ow_i * Cout + co_i).ravel()
    vals = w_hwio[:, kw_i.ravel(), ci_i.ravel(), co_i.ravel()]  # (KH, L)
    w_band = jnp.zeros((KH, WpC, OWC), compute_dtype)
    w_band = w_band.at[:, row_idx, col_idx].set(vals.astype(compute_dtype))

    b2d = jnp.tile(bias, OW).reshape(1, OWC)        # bias per output column

    # ---------- batch blocking (VMEM-budget aware) ----------
    itemsize = jnp.dtype(x_nchw.dtype).itemsize
    per_elem = itemsize * (Hp * WpC + OH * OWC)
    if batch_block is None:
        # ~4 MiB of blocks per element budget; blocks are double-buffered, so
        # this stays well inside v5e's default 16 MiB scoped VMEM.
        cap = max(1, (4 << 20) // max(1, per_elem))
        batch_block = _largest_divisor_leq(N, cap)
    assert N % batch_block == 0
    grid = (N // batch_block,)

    kernel = functools.partial(
        _conv2d_relu_kernel, B_blk=batch_block, OH=OH, KH=KH, stride=stride,
        compute_dtype=compute_dtype)

    cost = pl.CostEstimate(
        flops=2 * N * KH * OH * WpC * OWC,
        transcendentals=0,
        bytes_accessed=itemsize * (N * Hp * WpC + N * OH * OWC)
                       + jnp.dtype(compute_dtype).itemsize * KH * WpC * OWC)

    out_flat = pl.pallas_call(
        kernel,
        out_shape=jax.ShapeDtypeStruct((N, OH, OWC), x_nchw.dtype),
        grid=grid,
        in_specs=[
            # B_blk padded batch elements per grid step.
            pl.BlockSpec((batch_block, Hp, WpC), lambda n: (n, 0, 0)),
            # Constant operands: same block every step (stay resident in VMEM).
            pl.BlockSpec((KH, WpC, OWC), lambda n: (0, 0, 0)),
            pl.BlockSpec((1, OWC), lambda n: (0, 0)),
        ],
        out_specs=pl.BlockSpec((batch_block, OH, OWC), lambda n: (n, 0, 0)),
        compiler_params=pltpu.CompilerParams(
            dimension_semantics=("parallel",)),
        cost_estimate=cost,
    )(x_folded, w_band, b2d)

    # (N, OH, OW*Cout) -> NHWC -> NCHW (PyTorch output layout).
    out_nhwc = out_flat.reshape(N, OH, OW, Cout)
    return jnp.transpose(out_nhwc, (0, 3, 1, 2))


def _init_conv_params(key, in_channels, out_channels, kernel_size):
    """Deterministic init mimicking nn.Conv2d default (kaiming_uniform-ish)."""
    kw_key, kb_key = jax.random.split(key)
    fan_in = in_channels * kernel_size * kernel_size
    bound = float(np.sqrt(1.0 / fan_in))
    weight = jax.random.uniform(
        kw_key, (out_channels, in_channels, kernel_size, kernel_size),
        minval=-bound, maxval=bound, dtype=jnp.float32)
    bias = jax.random.uniform(
        kb_key, (out_channels,), minval=-bound, maxval=bound,
        dtype=jnp.float32)
    return weight, bias


if __name__ == "__main__":
    key = jax.random.PRNGKey(0)
    k_x, k_p = jax.random.split(key)

    # Conv2dBlock(in_channels=4, out_channels=8, kernel_size=3, stride=1, padding=1)
    N, Cin, H, W = 2, 4, 16, 16
    Cout, K, stride, padding = 8, 3, 1, 1

    x = jax.random.normal(k_x, (N, Cin, H, W), dtype=jnp.float32)
    weight, bias = _init_conv_params(k_p, Cin, Cout, K)

    fwd = jax.jit(functools.partial(conv2d_block_forward,
                                    stride=stride, padding=padding))
    out = jax.block_until_ready(fwd(x, weight, bias))

    # Reference: XLA conv (NCHW/OIHW, full-f32 precision) + bias + ReLU.
    ref = lax.conv_general_dilated(
        x, weight, window_strides=(stride, stride),
        padding=((padding, padding), (padding, padding)),
        dimension_numbers=("NCHW", "OIHW", "NCHW"),
        precision=lax.Precision.HIGHEST)
    ref = jnp.maximum(ref + bias.reshape(1, Cout, 1, 1), 0.0)
    np.testing.assert_allclose(np.asarray(out), np.asarray(ref),
                               rtol=1e-4, atol=1e-4)

    print("KERNEL_OK")
</pallas_src>

<mosaic_0001>
module attributes {stable_mosaic.version = 11 : i64} {
  func.func @_conv2d_relu_kernel(%arg0: i32, %arg1: memref<2x18x72xf32, #tpu.memory_space<vmem>>, %arg2: memref<3x72x128xf32, #tpu.memory_space<vmem>>, %arg3: memref<1x128xf32, #tpu.memory_space<vmem>>, %arg4: memref<2x16x128xf32, #tpu.memory_space<vmem>>) attributes {dimension_semantics = [#tpu.dimension_semantics<parallel>], iteration_bounds = array<i64: 1>, scalar_prefetch = 0 : i64, scratch_operands = 0 : i64, tpu.core_type = #tpu.core_type<tc>, window_params = [{transform_indices = @transform_0, window_bounds = array<i64: 2, 18, 72>}, {pipeline_mode = #tpu.pipeline_mode<synchronous>, transform_indices = @transform_1, window_bounds = array<i64: 3, 72, 128>}, {pipeline_mode = #tpu.pipeline_mode<synchronous>, transform_indices = @transform_2, window_bounds = array<i64: 1, 128>}, {transform_indices = @transform_3, window_bounds = array<i64: 2, 16, 128>}]} {
    %c0 = arith.constant 0 : index
    %c0_0 = arith.constant 0 : index
    %c0_1 = arith.constant 0 : index
    %0 = vector.load %arg2[%c0, %c0_0, %c0_1] : memref<3x72x128xf32, #tpu.memory_space<vmem>>, vector<1x72x128xf32>
    %1 = vector.shape_cast %0 : vector<1x72x128xf32> to vector<72x128xf32>
    %c0_2 = arith.constant 0 : index
    %c0_3 = arith.constant 0 : index
    %c0_4 = arith.constant 0 : index
    %2 = vector.load %arg1[%c0_2, %c0_3, %c0_4] : memref<2x18x72xf32, #tpu.memory_space<vmem>>, vector<2x16x72xf32>
    %3 = vector.shape_cast %2 : vector<2x16x72xf32> to vector<32x72xf32>
    %cst = arith.constant dense<0.000000e+00> : vector<32x128xf32>
    %4 = tpu.matmul %3, %1, %cst {dimension_numbers = #tpu.dot_dimension_numbers<[1], [0], [0], [1], [0, 0, 1, 1], [], []>} : vector<32x72xf32>, vector<72x128xf32>, vector<32x128xf32> -> vector<32x128xf32>
    %c1 = arith.constant 1 : index
    %c0_5 = arith.constant 0 : index
    %c0_6 = arith.constant 0 : index
    %5 = vector.load %arg2[%c1, %c0_5, %c0_6] : memref<3x72x128xf32, #tpu.memory_space<vmem>>, vector<1x72x128xf32>
    %6 = vector.shape_cast %5 : vector<1x72x128xf32> to vector<72x128xf32>
    %c0_7 = arith.constant 0 : index
    %c1_8 = arith.constant 1 : index
    %c0_9 = arith.constant 0 : index
    %7 = vector.load %arg1[%c0_7, %c1_8, %c0_9] : memref<2x18x72xf32, #tpu.memory_space<vmem>>, vector<2x16x72xf32>
    %8 = vector.shape_cast %7 : vector<2x16x72xf32> to vector<32x72xf32>
    %cst_10 = arith.constant dense<0.000000e+00> : vector<32x128xf32>
    %9 = tpu.matmul %8, %6, %cst_10 {dimension_numbers = #tpu.dot_dimension_numbers<[1], [0], [0], [1], [0, 0, 1, 1], [], []>} : vector<32x72xf32>, vector<72x128xf32>, vector<32x128xf32> -> vector<32x128xf32>
    %10 = arith.addf %4, %9 : vector<32x128xf32>
    %c2 = arith.constant 2 : index
    %c0_11 = arith.constant 0 : index
    %c0_12 = arith.constant 0 : index
    %11 = vector.load %arg2[%c2, %c0_11, %c0_12] : memref<3x72x128xf32, #tpu.memory_space<vmem>>, vector<1x72x128xf32>
    %12 = vector.shape_cast %11 : vector<1x72x128xf32> to vector<72x128xf32>
    %c0_13 = arith.constant 0 : index
    %c2_14 = arith.constant 2 : index
    %c0_15 = arith.constant 0 : index
    %13 = vector.load %arg1[%c0_13, %c2_14, %c0_15] : memref<2x18x72xf32, #tpu.memory_space<vmem>>, vector<2x16x72xf32>
    %14 = vector.shape_cast %13 : vector<2x16x72xf32> to vector<32x72xf32>
    %cst_16 = arith.constant dense<0.000000e+00> : vector<32x128xf32>
    %15 = tpu.matmul %14, %12, %cst_16 {dimension_numbers = #tpu.dot_dimension_numbers<[1], [0], [0], [1], [0, 0, 1, 1], [], []>} : vector<32x72xf32>, vector<72x128xf32>, vector<32x128xf32> -> vector<32x128xf32>
    %16 = arith.addf %10, %15 : vector<32x128xf32>
    %c0_17 = arith.constant 0 : index
    %c0_18 = arith.constant 0 : index
    %17 = vector.load %arg3[%c0_17, %c0_18] : memref<1x128xf32, #tpu.memory_space<vmem>>, vector<1x128xf32>
    %18 = vector.broadcast %17 : vector<1x128xf32> to vector<32x128xf32>
    %19 = arith.addf %16, %18 : vector<32x128xf32>
    %cst_19 = arith.constant 0.000000e+00 : f32
    %20 = vector.broadcast %cst_19 : f32 to vector<32x128xf32>
    %21 = arith.maximumf %19, %20 : vector<32x128xf32>
    %22 = vector.shape_cast %21 : vector<32x128xf32> to vector<2x16x128xf32>
    %c0_20 = arith.constant 0 : index
    %c0_21 = arith.constant 0 : index
    %c0_22 = arith.constant 0 : index
    %23 = vector.load %arg4[%c0_20, %c0_21, %c0_22] : memref<2x16x128xf32, #tpu.memory_space<vmem>>, vector<2x16x128xf32>
    tpu.vector_store %arg4[%c0_20, %c0_21, %c0_22], %22 {strides = array<i32>} : memref<2x16x128xf32, #tpu.memory_space<vmem>>, vector<2x16x128xf32>,
    return
  }
  func.func @transform_0(%arg0: i32) -> (i32, i32, i32) {
    %c0_i32 = arith.constant 0 : i32
    %c0_i32_0 = arith.constant 0 : i32
    %c0_i32_1 = arith.constant 0 : i32
    return %arg0, %c0_i32, %c0_i32_0 : i32, i32, i32
  }
  func.func @transform_1(%arg0: i32) -> (i32, i32, i32) {
    %c0_i32 = arith.constant 0 : i32
    %c0_i32_0 = arith.constant 0 : i32
    %c0_i32_1 = arith.constant 0 : i32
    %c0_i32_2 = arith.constant 0 : i32
    return %c0_i32, %c0_i32_0, %c0_i32_1 : i32, i32, i32
  }
  func.func @transform_2(%arg0: i32) -> (i32, i32) {
    %c0_i32 = arith.constant 0 : i32
    %c0_i32_0 = arith.constant 0 : i32
    %c0_i32_1 = arith.constant 0 : i32
    return %c0_i32, %c0_i32_0 : i32, i32
  }
  func.func @transform_3(%arg0: i32) -> (i32, i32, i32) {
    %c0_i32 = arith.constant 0 : i32
    %c0_i32_0 = arith.constant 0 : i32
    %c0_i32_1 = arith.constant 0 : i32
    return %arg0, %c0_i32, %c0_i32_0 : i32, i32, i32
  }
}

</mosaic_0001>

<bundles_post_ra>
// kernel: tile.8
= control target key start
LH: loop header
LB: loop body
LE: loop exit
PB: predicated region body
PF: predicated region fallthrough
CT: control target
= control target key end

     0   :  { %s28_s0 = inlined_call_operand.vmem [shape: f32[8], index: 0, kind: input, shape index: {}]   ;;  %s29_s1 = inlined_call_operand.vmem [shape: f32[16,8], index: 1, kind: output, shape index: {}]  }
   0x1   :  { %v4_v0 = vld [vmem:[%s28_s0] ss:$0 sm:$0xff] }
   0x2   :  { %5 = vst [vmem:[%s29_s1] sm:$0xff] %v4_v0  ;;  %8 = vst [vmem:[%s29_s1 + $0x8] sm:$0xff] %v4_v0 }

// kernel: tile.9
= control target key start
LH: loop header
LB: loop body
LE: loop exit
PB: predicated region body
PF: predicated region fallthrough
CT: control target
= control target key end

     0   :  { %s133_s10 = smov 120   ;;  %s134_s11 = smov 104   ;;  %vm3_vm0 = vcmask 64512   ;;  %vm9_vm1 = vcmask 1048512   ;;  %vm15_vm2 = vcmask 982912   ;;  %vm21_vm3 = vcmask 917312   ;;  %s209_s0 = inlined_call_operand.vmem [shape: f32[16,8], index: 0, kind: input, shape index: {}]   ;;  %s210_s1 = inlined_call_operand.vmem [shape: f32[1,128], index: 1, kind: output, shape index: {}]  }
   0x1   :  { %v103_v0 = vld [vmem:[%s209_s0 + $0xf] sm:$0x1]   ;;  %v105_v1 = vld [vmem:[%s209_s0 + $0xd] sm:$0x1]   ;;  %v104_v2 = vld [vmem:[%s209_s0 + $0xe] sm:$0x1]  }
   0x2   :  { %7 = vrot.lane.b32.xlu0 %v103_v0, %s133_s10  ;;  %19 = vrot.lane.b32.xlu1 %v105_v1, %s134_s11  ;;  %v106_v3 = vld [vmem:[%s209_s0 + $0xc] sm:$0x1]   ;;  %s135_s16 = smov 112   ;;  %s136_s17 = smov 96   ;;  %v107_v4 = vld [vmem:[%s209_s0 + $0xb] sm:$0x1]  }
   0x3   :  { %v108_v5 = vld [vmem:[%s209_s0 + $0xa] sm:$0x1]   ;;  %v2_v6 = vld [vmem:[%s209_s0] sm:$0x1]   ;;  %s137_s24 = smov 88   ;;  %s138_s25 = smov 80  }
   0x4   :  { %4 = vst.msk [vmem:[#allocation0] sm:$0x1] %vm3_vm0, %v2_v6   ;;  %v109_v7 = vld [vmem:[%s209_s0 + $0x9] sm:$0x1]   ;;  %v110_v8 = vld [vmem:[%s209_s0 + $0x8] sm:$0x1]  }
   0x5   :  { %s139_s30 = smov 72   ;;  %s140_s2 = smov 64   ;;  %v111_v9 = vld [vmem:[%s209_s0 + $0x7] sm:$0x1]   ;;  %v112_v10 = vld [vmem:[%s209_s0 + $0x6] sm:$0x1]  }
   0x6   :  { %13 = vrot.lane.b32.xlu0 %v104_v2, %s135_s16  ;;  %25 = vrot.lane.b32.xlu1 %v106_v3, %s136_s17  ;;  %s141_s7 = smov 56   ;;  %s142_s8 = smov 48   ;;  %v113_v11 = vld [vmem:[%s209_s0 + $0x5] sm:$0x1]   ;;  %v114_v12 = vld [vmem:[%s209_s0 + $0x4] sm:$0x1]  }
   0x7   :  { %s143_s13 = smov 40   ;;  %s144_s14 = smov 32   ;;  %v115_v13 = vld [vmem:[%s209_s0 + $0x3] sm:$0x1]   ;;  %v116_v14 = vld [vmem:[%s209_s0 + $0x2] sm:$0x1]  }
   0x8   :  { %s145_s19 = smov 24   ;;  %s146_s20 = smov 16   ;;  %v117_v15 = vld [vmem:[%s209_s0 + $0x1] sm:$0x1]   ;;  %vm27_vm4 = vcmask 851712   ;;  %vm33_vm5 = vcmask 786112  }
   0x9   :  { %s147_s0 = smov 8   ;;  %vm39_vm6 = vcmask 720512   ;;  %vm45_vm7 = vcmask 654912   ;;  %vm51_vm8 = vcmask 589312   ;;  %vm57_vm9 = vcmask 523712  }
   0xa   :  { %31 = vrot.lane.b32.xlu0 %v107_v4, %s137_s24  ;;  %37 = vrot.lane.b32.xlu1 %v108_v5, %s138_s25  ;;  %vm63_vm10 = vcmask 458112   ;;  %vm69_vm11 = vcmask 392512   ;;  %vm75_vm12 = vcmask 326912   ;;  %vm81_vm13 = vcmask 261312  }
   0xb   :  { %vm87_vm14 = vcmask 195712   ;;  %vm93_vm15 = vcmask 130112  }
   0xe   :  { %43 = vrot.lane.b32.xlu0 %v109_v7, %s139_s30  ;;  %49 = vrot.lane.b32.xlu1 %v110_v8, %s140_s2 }
  0x12   :  { %55 = vrot.lane.b32.xlu0 %v111_v9, %s141_s7  ;;  %61 = vrot.lane.b32.xlu1 %v112_v10, %s142_s8 }
  0x16   :  { %67 = vrot.lane.b32.xlu0 %v113_v11, %s143_s13  ;;  %73 = vrot.lane.b32.xlu1 %v114_v12, %s144_s14 }
  0x1a   :  { %79 = vrot.lane.b32.xlu0 %v115_v13, %s145_s19  ;;  %85 = vrot.lane.b32.xlu1 %v116_v14, %s146_s20 }
  0x1e   :  { %91 = vrot.lane.b32.xlu0 %v117_v15, %s147_s0 }
  0x74   :  { %v8_v16 = vpop.permute.xlu0 %7   ;;  %v20_v17 = vpop.permute.xlu1 %19  }
  0x75   :  { %10 = vst.msk [vmem:[#allocation0] sm:$0x1] %vm9_vm1, %v8_v16  }
  0x78   :  { %v14_v18 = vpop.permute.xlu0 %13   ;;  %v26_v19 = vpop.permute.xlu1 %25  }
  0x79   :  { %16 = vst.msk [vmem:[#allocation0] sm:$0x1] %vm15_vm2, %v14_v18  }
  0x7a   :  { %22 = vst.msk [vmem:[#allocation0] sm:$0x1] %vm21_vm3, %v20_v17  }
  0x7b   :  { %28 = vst.msk [vmem:[#allocation0] sm:$0x1] %vm27_vm4, %v26_v19  }
  0x7c   :  { %v32_v20 = vpop.permute.xlu0 %31   ;;  %v38_v21 = vpop.permute.xlu1 %37  }
  0x7d   :  { %34 = vst.msk [vmem:[#allocation0] sm:$0x1] %vm33_vm5, %v32_v20  }
  0x7e   :  { %40 = vst.msk [vmem:[#allocation0] sm:$0x1] %vm39_vm6, %v38_v21  }
  0x80   :  { %v44_v22 = vpop.permute.xlu0 %43   ;;  %v50_v23 = vpop.permute.xlu1 %49  }
  0x81   :  { %46 = vst.msk [vmem:[#allocation0] sm:$0x1] %vm45_vm7, %v44_v22  }
  0x82   :  { %52 = vst.msk [vmem:[#allocation0] sm:$0x1] %vm51_vm8, %v50_v23  }
  0x84   :  { %v56_v24 = vpop.permute.xlu0 %55   ;;  %v62_v25 = vpop.permute.xlu1 %61  }
  0x85   :  { %58 = vst.msk [vmem:[#allocation0] sm:$0x1] %vm57_vm9, %v56_v24  }
  0x86   :  { %64 = vst.msk [vmem:[#allocation0] sm:$0x1] %vm63_vm10, %v62_v25  }
  0x88   :  { %v68_v26 = vpop.permute.xlu0 %67   ;;  %v74_v27 = vpop.permute.xlu1 %73  }
  0x89   :  { %70 = vst.msk [vmem:[#allocation0] sm:$0x1] %vm69_vm11, %v68_v26  }
  0x8a   :  { %76 = vst.msk [vmem:[#allocation0] sm:$0x1] %vm75_vm12, %v74_v27  }
  0x8c   :  { %v80_v28 = vpop.permute.xlu0 %79   ;;  %v86_v29 = vpop.permute.xlu1 %85  }
  0x8d   :  { %82 = vst.msk [vmem:[#allocation0] sm:$0x1] %vm81_vm13, %v80_v28  }
  0x8e   :  { %88 = vst.msk [vmem:[#allocation0] sm:$0x1] %vm87_vm14, %v86_v29  }
  0x90   :  { %v92_v30 = vpop.permute.xlu0 %91  }
  0x91   :  { %94 = vst.msk [vmem:[#allocation0] sm:$0x1] %vm93_vm15, %v92_v30  }
  0x98   :  { %v99_v31 = vld [vmem:[#allocation0] sm:$0x1] }
  0x99   :  { %102 = vst [vmem:[%s210_s1] sm:$0x1] %v99_v31 }

// kernel: conv2d_block_forward.1
= control target key start
LH: loop header
LB: loop body
LE: loop exit
PB: predicated region body
PF: predicated region fallthrough
CT: control target
= control target key end

     0   :  { %vm41_vm0 = vcmask 588800   ;;  %s698_s1 = inlined_call_operand.vmem [shape: f32[3,72,128], index: 1, kind: input, shape index: {}]   ;;  %s699_s0 = inlined_call_operand.vmem [shape: f32[2,18,72], index: 0, kind: input, shape index: {}]   ;;  %s700_s2 = inlined_call_operand.vmem [shape: f32[1,128], index: 2, kind: input, shape index: {}]   ;;  %s701_s3 = inlined_call_operand.vmem [shape: f32[2,16,128], index: 3, kind: output, shape index: {}]  }
   0x1   :  { %v382_v0 = vld [vmem:[%s698_s1 + $0x88] sm:$0xff]  ;;  %v22_v1 = vld [vmem:[%s698_s1 + $0x40] sm:$0xff]  ;;  %v21_v3 = vld [vmem:[%s698_s1 + $0x38] sm:$0xff] }
   0x2   :  { %v381_v2 = vld [vmem:[%s698_s1 + $0x80] sm:$0xff]  ;;  %444 = vmatprep.subr.mxu0 %v382_v0  ;;  %468 = vmatprep.subr.mxu1 %v22_v1  ;;  %v380_v4 = vld [vmem:[%s698_s1 + $0x78] sm:$0xff]  ;;  %v20_v5 = vld [vmem:[%s698_s1 + $0x30] sm:$0xff] }
   0x3   :  { %445 = vmatpush3.msra.mxu0 %v382_v0  ;;  %469 = vmatpush3.msra.mxu1 %v22_v1  ;;  %v379_v6 = vld [vmem:[%s698_s1 + $0x70] sm:$0xff]  ;;  %v19_v7 = vld [vmem:[%s698_s1 + $0x28] sm:$0xff]  ;;  %v18_v9 = vld [vmem:[%s698_s1 + $0x20] sm:$0xff] }
   0x4   :  { %446 = vmatprep.subr.mxu0 %v381_v2  ;;  %470 = vmatprep.subr.mxu1 %v21_v3  ;;  %v378_v8 = vld [vmem:[%s698_s1 + $0x68] sm:$0xff]  ;;  %v377_v10 = vld [vmem:[%s698_s1 + $0x60] sm:$0xff]  ;;  %v17_v11 = vld [vmem:[%s698_s1 + $0x18] sm:$0xff] }
   0x5   :  { %447 = vmatpush3.msra.mxu0 %v381_v2  ;;  %471 = vmatpush3.msra.mxu1 %v21_v3  ;;  %v376_v12 = vld [vmem:[%s698_s1 + $0x58] sm:$0xff]  ;;  %v16_v13 = vld [vmem:[%s698_s1 + $0x10] sm:$0xff]  ;;  %v15_v15 = vld [vmem:[%s698_s1 + $0x8] sm:$0xff] }
   0x6   :  { %448 = vmatprep.subr.mxu0 %v380_v4  ;;  %472 = vmatprep.subr.mxu1 %v20_v5  ;;  %v375_v14 = vld [vmem:[%s698_s1 + $0x50] sm:$0xff]  ;;  %v374_v16 = vld [vmem:[%s698_s1 + $0x48] sm:$0xff]  ;;  %v14_v17 = vld [vmem:[%s698_s1] sm:$0xff] }
   0x7   :  { %449 = vmatpush3.msra.mxu0 %v380_v4  ;;  %473 = vmatpush3.msra.mxu1 %v20_v5  ;;  %v37_v18 = vld [vmem:[%s699_s0 + $0x1] sm:$0xff]  ;;  %v38_v20 = vld [vmem:[%s699_s0 + $0x9] sm:$0xff]  ;;  %v396_v25 = vld [vmem:[%s698_s1 + $0xb8] sm:$0xff] }
   0x8   :  { %450 = vmatprep.subr.mxu0 %v379_v6  ;;  %474 = vmatprep.subr.mxu1 %v19_v7  ;;  %v23_v19 = vld [vmem:[%s699_s0] sm:$0xff]  ;;  %v24_v21 = vld [vmem:[%s699_s0 + $0x8] sm:$0xff]  ;;  %v399_v22 = vld [vmem:[%s698_s1 + $0xd0] sm:$0xff] }
   0x9   :  { %451 = vmatpush3.msra.mxu0 %v379_v6  ;;  %475 = vmatpush3.msra.mxu1 %v19_v7  ;;  %v398_v23 = vld [vmem:[%s698_s1 + $0xc8] sm:$0xff]  ;;  %v397_v24 = vld [vmem:[%s698_s1 + $0xc0] sm:$0xff]  ;;  %v395_v26 = vld [vmem:[%s698_s1 + $0xb0] sm:$0xff] }
   0xa   :  { %452 = vmatprep.subr.mxu0 %v378_v8  ;;  %476 = vmatprep.subr.mxu1 %v18_v9  ;;  %v394_v27 = vld [vmem:[%s698_s1 + $0xa8] sm:$0xff]  ;;  %v39_v28 = vld [vmem:[%s699_s0 + $0x19] sm:$0xff]  ;;  %v391_v34 = vld [vmem:[%s698_s1 + $0x90] sm:$0xff] }
   0xb   :  { %453 = vmatpush3.msra.mxu0 %v378_v8  ;;  %477 = vmatpush3.msra.mxu1 %v18_v9  ;;  %v25_v29 = vld [vmem:[%s699_s0 + $0x18] sm:$0xff]  ;;  %v40_v30 = vld [vmem:[%s699_s0 + $0x21] sm:$0xff]  ;;  %v247_v37 = vld [vmem:[%s699_s0 + $0xa] sm:$0xff] }
   0xc   :  { %454 = vmatprep.subr.mxu0 %v377_v10  ;;  %478 = vmatprep.subr.mxu1 %v17_v11  ;;  %v26_v31 = vld [vmem:[%s699_s0 + $0x20] sm:$0xff]  ;;  %v392_v33 = vld [vmem:[%s698_s1 + $0x98] sm:$0xff] }
   0xd   :  { %455 = vmatpush3.msra.mxu0 %v377_v10  ;;  %479 = vmatpush3.msra.mxu1 %v17_v11  ;;  %v393_v32 = vld [vmem:[%s698_s1 + $0xa0] sm:$0xff] }
   0xe   :  { %456 = vmatprep.subr.mxu0 %v376_v12  ;;  %480 = vmatprep.subr.mxu1 %v16_v13  ;;  %v246_v35 = vld [vmem:[%s699_s0 + $0x2] sm:$0xff]  ;;  %v248_v36 = vld [vmem:[%s699_s0 + $0x1a] sm:$0xff] }
   0xf   :  { %457 = vmatpush3.msra.mxu0 %v376_v12  ;;  %481 = vmatpush3.msra.mxu1 %v16_v13  ;;  %v249_v38 = vld [vmem:[%s699_s0 + $0x22] sm:$0xff]  ;;  %v404_v50 = vld [vmem:[%s700_s2] ss:$0 sm:$0xff] }
  0x10   :  { %458 = vmatprep.subr.mxu0 %v375_v14  ;;  %482 = vmatprep.subr.mxu1 %v15_v15 }
  0x11   :  { %459 = vmatpush3.msra.mxu0 %v375_v14  ;;  %483 = vmatpush3.msra.mxu1 %v15_v15 }
  0x12   :  { %460 = vmatprep.subr.mxu0 %v374_v16  ;;  %484 = vmatprep.subr.mxu1 %v14_v17 }
  0x13   :  { %461 = vmatpush3.msra.mxu0 %v374_v16  ;;  %462 = vmatprep.mubr.msk.f32.mxu0 %vm41_vm0, %v37_v18 }
  0x14   :  { %485 = vmatpush3.msra.mxu1 %v14_v17  ;;  %486 = vmatprep.mubr.msk.f32.mxu1 %vm41_vm0, %v23_v19 }
  0x15   :  { %463 = vmatmul.mubr.msk.f32.vlgmr.msra.gmra.mxu0 %vm41_vm0, %v38_v20  ;;  %487 = vmatmul.mubr.msk.f32.vlgmr.msra.gmra.mxu1 %vm41_vm0, %v24_v21 }
  0x16   :  { %492 = vmatprep.subr.mxu0 %v399_v22  ;;  %516 = vmatprep.subr.mxu1 %v399_v22 }
  0x17   :  { %493 = vmatpush3.msra.mxu0 %v399_v22  ;;  %525 = vmatpush3.msra.mxu1 %v399_v22 }
  0x18   :  { %494 = vmatprep.subr.mxu0 %v398_v23  ;;  %517 = vmatprep.subr.mxu1 %v398_v23 }
  0x19   :  { %495 = vmatpush3.msra.mxu0 %v398_v23  ;;  %526 = vmatpush3.msra.mxu1 %v398_v23 }
  0x1a   :  { %496 = vmatprep.subr.mxu0 %v397_v24  ;;  %518 = vmatprep.subr.mxu1 %v397_v24 }
  0x1b   :  { %497 = vmatpush3.msra.mxu0 %v397_v24  ;;  %527 = vmatpush3.msra.mxu1 %v397_v24 }
  0x1c   :  { %498 = vmatprep.subr.mxu0 %v396_v25  ;;  %519 = vmatprep.subr.mxu1 %v396_v25 }
  0x1d   :  { %499 = vmatpush3.msra.mxu0 %v396_v25  ;;  %528 = vmatpush3.msra.mxu1 %v396_v25 }
  0x1e   :  { %500 = vmatprep.subr.mxu0 %v395_v26  ;;  %520 = vmatprep.subr.mxu1 %v395_v26 }
  0x1f   :  { %501 = vmatpush3.msra.mxu0 %v395_v26  ;;  %529 = vmatpush3.msra.mxu1 %v395_v26 }
  0x20   :  { %502 = vmatprep.subr.mxu0 %v394_v27  ;;  %521 = vmatprep.subr.mxu1 %v394_v27 }
  0x21   :  { %465 = vmatprep.mubr.msk.f32.mxu0 %vm41_vm0, %v39_v28  ;;  %489 = vmatprep.mubr.msk.f32.mxu1 %vm41_vm0, %v25_v29 }
  0x22   :  { %503 = vmatpush3.msra.mxu0 %v394_v27  ;;  %530 = vmatpush3.msra.mxu1 %v394_v27 }
  0x23   :  { %466 = vmatmul.mubr.msk.f32.gmra.mxu0 %vm41_vm0, %v40_v30  ;;  %490 = vmatmul.mubr.msk.f32.gmra.mxu1 %vm41_vm0, %v26_v31 }
  0x24   :  { %504 = vmatprep.subr.mxu0 %v393_v32  ;;  %522 = vmatprep.subr.mxu1 %v393_v32 }
  0x25   :  { %505 = vmatpush3.msra.mxu0 %v393_v32  ;;  %531 = vmatpush3.msra.mxu1 %v393_v32 }
  0x26   :  { %506 = vmatprep.subr.mxu0 %v392_v33  ;;  %523 = vmatprep.subr.mxu1 %v392_v33 }
  0x27   :  { %507 = vmatpush3.msra.mxu0 %v392_v33  ;;  %532 = vmatpush3.msra.mxu1 %v392_v33 }
  0x28   :  { %508 = vmatprep.subr.mxu0 %v391_v34  ;;  %524 = vmatprep.subr.mxu1 %v391_v34 }
  0x29   :  { %509 = vmatpush3.msra.mxu0 %v391_v34  ;;  %533 = vmatpush3.msra.mxu1 %v391_v34 }
  0x2a   :  { %510 = vmatprep.mubr.msk.f32.mxu0 %vm41_vm0, %v246_v35  ;;  %513 = vmatprep.mubr.msk.f32.mxu1 %vm41_vm0, %v248_v36 }
  0x2b   :  { %511 = vmatmul.mubr.msk.f32.vlgmr.msra.gmra.mxu0 %vm41_vm0, %v247_v37  ;;  %514 = vmatmul.mubr.msk.f32.vlgmr.msra.gmra.mxu1 %vm41_vm0, %v249_v38 }
  0xd5   :  { %v464_v39 = vpop.f32.mrf.mxu0  ;;  %v488_v40 = vpop.f32.mrf.mxu1 }
  0xd6   :  { %v223_v47 = vadd.f32 %v488_v40, %v464_v39 }
  0xd7   :  { %v120_v41 = vpop.f32.mrf.mxu0  ;;  %v217_v42 = vpop.f32.mrf.mxu1 }
  0xd8   :  { %v218_v52 = vadd.f32 %v217_v42, %v120_v41 }
  0xe3   :  { %v467_v43 = vpop.f32.mrf.mxu0  ;;  %v491_v44 = vpop.f32.mrf.mxu1 }
  0xe4   :  { %v233_v48 = vadd.f32 %v491_v44, %v467_v43 }
  0xe5   :  { %v130_v45 = vpop.f32.mrf.mxu0  ;;  %v227_v46 = vpop.f32.mrf.mxu1 }
  0xe6   :  { %v228_v53 = vadd.f32 %v227_v46, %v130_v45 }
  0xeb   :  { %v512_v49 = vpop.f32.mrf.mxu0  ;;  %v515_v51 = vpop.f32.mrf.mxu1 }
  0xec   :  { %v348_v54 = vadd.f32 %v512_v49, %v223_v47  ;;  %v350_v55 = vadd.f32 %v515_v51, %v233_v48 }
  0xed   :  { %v328_v56 = vpop.f32.mrf.mxu0  ;;  %v338_v57 = vpop.f32.mrf.mxu1 }
  0xee   :  { %v359_v58 = vadd.f32 %v404_v50, %v348_v54  ;;  %v361_v59 = vadd.f32 %v404_v50, %v350_v55  ;;  %v347_v60 = vadd.f32 %v328_v56, %v218_v52  ;;  %v349_v61 = vadd.f32 %v338_v57, %v228_v53 }
  0xf0   :  { %v363_v62 = vmax.f32 %v359_v58, 0.0  ;;  %v365_v63 = vmax.f32 %v361_v59, 0.0  ;;  %v358_v0 = vadd.f32 %v404_v50, %v347_v60  ;;  %v360_v1 = vadd.f32 %v404_v50, %v349_v61 }
  0xf2   :  { %367 = vst [vmem:[%s701_s3 + $0x8] sm:$0xff] %v363_v62  ;;  %369 = vst [vmem:[%s701_s3 + $0x18] sm:$0xff] %v365_v63  ;;  %v362_v2 = vmax.f32 %v358_v0, 0.0  ;;  %v364_v3 = vmax.f32 %v360_v1, 0.0 }
  0xf4   :  { %366 = vst [vmem:[%s701_s3] sm:$0xff] %v362_v2  ;;  %368 = vst [vmem:[%s701_s3 + $0x10] sm:$0xff] %v364_v3 }

</bundles_post_ra>
